<compile_context>
chip_gen: v7x
topology: tpu7x:2x2x1
jax: 0.10.0
libtpu: 0.0.40
codegen_flags: <defaults>
</compile_context>

<pallas_src>
import jax
import jax.numpy as jnp
from jax.experimental import pallas as pl
from jax.experimental.pallas import tpu as pltpu


def _make_pointer_kernel(affine: bool, masked: bool, compute_dtype):
    """Build a kernel specialized for (affine?, masked?) so unused inputs are
    never passed / DMA'd at all."""

    def kernel(*refs):
        i = 0
        w_ref = None
        if affine:
            w_ref = refs[i]; i += 1
        q_ref = refs[i]; i += 1
        key_ref = refs[i]; i += 1
        mask_ref = None
        if masked:
            mask_ref = refs[i]; i += 1
        out_ref = refs[i]

        # Cast to the MXU compute dtype *inside* the kernel (VMEM-resident),
        # so HBM only ever sees the caller's native dtype once.
        q = q_ref[...].astype(compute_dtype)        # (T, Bb, Q)
        key = key_ref[...].astype(compute_dtype)    # (Bb, Lb, Ks)
        t_dim, b_dim, q_dim = q.shape
        _, _, k_dim = key.shape

        # Batch-dim first so the batched contraction below has leading batch
        # dims on both operands.
        qT = jnp.transpose(q, (1, 0, 2))            # (Bb, T, Q)

        if affine:
            # Project the queries (Bb*T rows) instead of the keys (L rows):
            # scores = (q @ W) @ key^T == q @ (key @ W^T)^T, but T << L.
            w = w_ref[...].astype(compute_dtype)    # (Q, Ks)
            q2 = qT.reshape(b_dim * t_dim, q_dim)
            qp2 = jax.lax.dot_general(
                q2, w, (((1,), (0,)), ((), ())),
                preferred_element_type=jnp.float32)              # (Bb*T, Ks) f32
            qp = qp2.astype(compute_dtype).reshape(b_dim, t_dim, k_dim)
        else:
            qp = qT                                              # (Bb, T, Q==Ks)

        # scores[b, t, l] = sum_k qp[b, t, k] * key[b, l, k]   (f32 accumulation)
        scores = jnp.einsum('btk,blk->btl', qp, key,
                            preferred_element_type=jnp.float32)  # (Bb, T, Lb)

        # Write the output directly in the [T, B, L] HBM layout.
        out = jnp.transpose(scores, (1, 0, 2))                   # (T, Bb, Lb)

        if masked:
            mask = mask_ref[...]                                 # (Bb, Lb)
            out = jnp.where(mask[None, :, :] != 0, float('-inf'), out)

        out_ref[...] = out

    return kernel


def _step_bytes(bb, bl, T, Q, Ks, in_itemsize, c_itemsize, masked, affine):
    """Approximate VMEM bytes for one grid step (native tiles + in-kernel
    compute-dtype copies of the big operands + f32 output tile)."""
    total = bb * bl * Ks * (in_itemsize + c_itemsize)       # key tile + cast copy
    total += T * bb * Q * (in_itemsize + c_itemsize)        # query tile + cast copy
    total += T * bb * bl * 4                                 # f32 output tile
    if masked:
        total += bb * bl * 4                                 # f32 mask tile
    if affine:
        total += Q * Ks * (in_itemsize + c_itemsize)         # resident weight
    return total


def _choose_tiling(B, L, bytes_fn, budget_bytes=6 * 1024 * 1024):
    """Pick (block_b, block_l).

    Constraints / preferences:
      * block_b divides B and is either B or a multiple of 8 (sublane alignment
        of the second-to-last dim of the (T, Bb, *) blocks).
      * block_l is either L or a multiple of 128 dividing L (lane alignment of
        the mask / output last dim).
      * the per-step block set fits a conservative VMEM budget (stays under the
        v5e 16 MiB default scoped VMEM even after double-buffering).
      * prefer >= 2 grid steps when possible (megacore sharding on v7x).
    """
    bb_cands = sorted(d for d in range(1, B + 1)
                      if B % d == 0 and (d == B or d % 8 == 0))
    bl_cands = sorted({L} | {d for d in range(128, L, 128) if L % d == 0},
                      reverse=True)
    for bl in bl_cands:                                  # biggest L tile first
        fitting = [bb for bb in bb_cands if bytes_fn(bb, bl) <= budget_bytes]
        if fitting:
            multi = [bb for bb in fitting if (B // bb) * (L // bl) >= 2]
            return (max(multi) if multi else max(fitting)), bl
    # Nothing fits the conservative budget; fall back to the smallest legal tile.
    return min(bb_cands), min(bl_cands)


def pointer_net_forward(key_encodings, query_encoding, key_linear_w=None,
                        key_mask=None, attention_type='affine',
                        compute_dtype=jnp.bfloat16, block_b=None, block_l=None):
    """Pallas implementation of PointerNet.forward.

    key_encodings  : [B, L, Ks]
    query_encoding : [T, B, Q]
    key_linear_w   : [Q, Ks] (nn.Linear(key_size, query_size, bias=False) weight);
                     ignored (may be None) when attention_type == 'dot'
    key_mask       : [B, L] (bool / 0-1 numeric) or None
    returns        : [T, B, L] float32, squeezed to [B, L] when T == 1
    """
    assert attention_type in ('affine', 'dot')
    B, L, Ks = key_encodings.shape
    T, B2, Q = query_encoding.shape
    assert B == B2
    affine = attention_type == 'affine'
    masked = key_mask is not None
    if affine:
        assert key_linear_w is not None and key_linear_w.shape == (Q, Ks)
    else:
        assert Ks == Q, "'dot' attention requires key_size == query_size"

    in_itemsize = max(jnp.dtype(key_encodings.dtype).itemsize,
                      jnp.dtype(query_encoding.dtype).itemsize)
    c_itemsize = jnp.dtype(compute_dtype).itemsize
    bytes_fn = lambda bb, bl: _step_bytes(bb, bl, T, Q, Ks, in_itemsize,
                                          c_itemsize, masked, affine)

    auto_bb, auto_bl = _choose_tiling(B, L, bytes_fn)
    bb = auto_bb if block_b is None else block_b
    bl = auto_bl if block_l is None else block_l
    assert B % bb == 0 and (bb == B or bb % 8 == 0)
    assert L % bl == 0 and (bl == L or bl % 128 == 0)

    grid = (B // bb, L // bl)

    in_specs = []
    args = []
    if affine:
        # Small, grid-invariant weight: same block every step -> stays resident.
        in_specs.append(pl.BlockSpec((Q, Ks), lambda b, l: (0, 0)))
        args.append(key_linear_w)
    # Query in its native [T, B, Q] layout; invariant along the inner L axis.
    in_specs.append(pl.BlockSpec((T, bb, Q), lambda b, l: (0, b, 0)))
    args.append(query_encoding)
    in_specs.append(pl.BlockSpec((bb, bl, Ks), lambda b, l: (b, l, 0)))
    args.append(key_encodings)
    if masked:
        # [B, L] mask, broadcast across T inside the kernel (no [T,B,L] blow-up).
        in_specs.append(pl.BlockSpec((bb, bl), lambda b, l: (b, l)))
        args.append(key_mask.astype(jnp.float32))

    out_tbl = pl.pallas_call(
        _make_pointer_kernel(affine, masked, compute_dtype),
        out_shape=jax.ShapeDtypeStruct((T, B, L), jnp.float32),
        grid_spec=pltpu.PrefetchScalarGridSpec(
            num_scalar_prefetch=0,
            grid=grid,
            in_specs=in_specs,
            out_specs=pl.BlockSpec((T, bb, bl), lambda b, l: (0, b, l)),
        ),
        compiler_params=pltpu.CompilerParams(
            dimension_semantics=("parallel", "parallel")),
    )(*args)

    if T == 1:
        return out_tbl[0]          # torch .squeeze(0)
    return out_tbl


if __name__ == "__main__":
    # Small deterministic example shapes.
    B, L, T = 2, 16, 8             # batch, len_q, tgt_num
    Ks, Q = 64, 32                 # key_size, query_size

    root = jax.random.PRNGKey(0)
    k_key, k_qry, k_w, k_key2, k_qry2, k_k4, k_q4, k_m4 = jax.random.split(root, 8)

    key_encodings = jax.random.normal(k_key, (B, L, Ks), jnp.float32)
    query_encoding = jax.random.normal(k_qry, (T, B, Q), jnp.float32)
    # nn.Linear(key_size, query_size, bias=False): weight shape [Q, Ks]
    key_linear_w = jax.random.uniform(
        k_w, (Q, Ks), jnp.float32, -1.0 / jnp.sqrt(Ks), 1.0 / jnp.sqrt(Ks))
    # mask out the last 3 key positions of batch 1
    key_mask = jnp.zeros((B, L), jnp.float32).at[1, L - 3:].set(1.0)

    # ---- 1) affine + mask, bf16 MXU compute (performance default) ----
    out_bf = pointer_net_forward(key_encodings, query_encoding, key_linear_w,
                                 key_mask=key_mask, attention_type='affine')
    out_bf = jax.block_until_ready(out_bf)
    assert out_bf.shape == (T, B, L), out_bf.shape

    kb = key_encodings.astype(jnp.bfloat16).astype(jnp.float32)
    qb = query_encoding.astype(jnp.bfloat16).astype(jnp.float32)
    wb = key_linear_w.astype(jnp.bfloat16).astype(jnp.float32)
    keyp_b = jnp.einsum('blk,qk->blq', kb, wb)
    ref_bf = jnp.einsum('blq,tbq->tbl', keyp_b, qb)
    ref_bf = jnp.where(key_mask[None, :, :] != 0, -jnp.inf, ref_bf)
    finite = jnp.isfinite(ref_bf)
    assert bool(jnp.all(jnp.isfinite(out_bf) == finite))
    assert bool(jnp.allclose(jnp.where(finite, out_bf, 0.0),
                             jnp.where(finite, ref_bf, 0.0),
                             atol=3e-2, rtol=3e-2))

    # ---- 2) affine + mask, full f32 compute (tight numerical check) ----
    out_f32 = pointer_net_forward(key_encodings, query_encoding, key_linear_w,
                                  key_mask=key_mask, attention_type='affine',
                                  compute_dtype=jnp.float32)
    out_f32 = jax.block_until_ready(out_f32)
    keyp32 = jnp.einsum('blk,qk->blq', key_encodings, key_linear_w)
    ref32 = jnp.einsum('blq,tbq->tbl', keyp32, query_encoding)
    ref32 = jnp.where(key_mask[None, :, :] != 0, -jnp.inf, ref32)
    fin32 = jnp.isfinite(ref32)
    assert bool(jnp.all(jnp.isfinite(out_f32) == fin32))
    assert bool(jnp.allclose(jnp.where(fin32, out_f32, 0.0),
                             jnp.where(fin32, ref32, 0.0),
                             atol=2e-3, rtol=2e-3))

    # ---- 3) 'dot' attention, T == 1, no mask (exercises squeeze(0) path) ----
    key2 = jax.random.normal(k_key2, (B, L, Q), jnp.float32)
    q1 = jax.random.normal(k_qry2, (1, B, Q), jnp.float32)
    out_dot = pointer_net_forward(key2, q1, None, key_mask=None,
                                  attention_type='dot',
                                  compute_dtype=jnp.float32)
    out_dot = jax.block_until_ready(out_dot)
    assert out_dot.shape == (B, L), out_dot.shape
    ref_dot = jnp.einsum('blq,bq->bl', key2, q1[0])
    assert bool(jnp.allclose(out_dot, ref_dot, atol=2e-3, rtol=2e-3))

    # ---- 4) longer key sequence, explicit 128-lane L tiling (2-D grid path) ----
    B4, L4, T4 = 2, 256, 4
    key4 = jax.random.normal(k_k4, (B4, L4, Ks), jnp.float32)
    q4 = jax.random.normal(k_q4, (T4, B4, Q), jnp.float32)
    mask4 = (jax.random.uniform(k_m4, (B4, L4)) < 0.2).astype(jnp.float32)
    out4 = pointer_net_forward(key4, q4, key_linear_w, key_mask=mask4,
                               attention_type='affine',
                               compute_dtype=jnp.float32,
                               block_b=2, block_l=128)
    out4 = jax.block_until_ready(out4)
    assert out4.shape == (T4, B4, L4), out4.shape
    keyp4 = jnp.einsum('blk,qk->blq', key4, key_linear_w)
    ref4 = jnp.einsum('blq,tbq->tbl', keyp4, q4)
    ref4 = jnp.where(mask4[None, :, :] != 0, -jnp.inf, ref4)
    fin4 = jnp.isfinite(ref4)
    assert bool(jnp.all(jnp.isfinite(out4) == fin4))
    assert bool(jnp.allclose(jnp.where(fin4, out4, 0.0),
                             jnp.where(fin4, ref4, 0.0),
                             atol=2e-3, rtol=2e-3))

    print("KERNEL_OK")
</pallas_src>

<mosaic_0001>
module attributes {stable_mosaic.version = 11 : i64} {
  func.func @kernel(%arg0: i32, %arg1: i32, %arg2: memref<32x64xf32, #tpu.memory_space<vmem>>, %arg3: memref<8x2x32xf32, #tpu.memory_space<vmem>>, %arg4: memref<2x16x64xf32, #tpu.memory_space<vmem>>, %arg5: memref<2x16xf32, #tpu.memory_space<vmem>>, %arg6: memref<8x2x16xf32, #tpu.memory_space<vmem>>) attributes {dimension_semantics = [#tpu.dimension_semantics<parallel>, #tpu.dimension_semantics<parallel>], iteration_bounds = array<i64: 1, 1>, scalar_prefetch = 0 : i64, scratch_operands = 0 : i64, tpu.core_type = #tpu.core_type<tc>, window_params = [{pipeline_mode = #tpu.pipeline_mode<synchronous>, transform_indices = @transform_0, window_bounds = array<i64: 32, 64>}, {transform_indices = @transform_1, window_bounds = array<i64: 8, 2, 32>}, {transform_indices = @transform_2, window_bounds = array<i64: 2, 16, 64>}, {transform_indices = @transform_3, window_bounds = array<i64: 2, 16>}, {transform_indices = @transform_4, window_bounds = array<i64: 8, 2, 16>}]} {
    %c0 = arith.constant 0 : index
    %c0_0 = arith.constant 0 : index
    %c0_1 = arith.constant 0 : index
    %0 = vector.load %arg3[%c0, %c0_0, %c0_1] : memref<8x2x32xf32, #tpu.memory_space<vmem>>, vector<8x2x32xf32>
    %1 = arith.truncf %0 : vector<8x2x32xf32> to vector<8x2x32xbf16>
    %c0_2 = arith.constant 0 : index
    %c0_3 = arith.constant 0 : index
    %c0_4 = arith.constant 0 : index
    %2 = vector.load %arg4[%c0_2, %c0_3, %c0_4] : memref<2x16x64xf32, #tpu.memory_space<vmem>>, vector<2x16x64xf32>
    %3 = arith.truncf %2 : vector<2x16x64xf32> to vector<2x16x64xbf16>
    %4 = tpu.transpose %1, [1, 0, 2] : vector<8x2x32xbf16> -> vector<2x8x32xbf16>
    %c0_5 = arith.constant 0 : index
    %c0_6 = arith.constant 0 : index
    %5 = vector.load %arg2[%c0_5, %c0_6] : memref<32x64xf32, #tpu.memory_space<vmem>>, vector<32x64xf32>
    %6 = arith.truncf %5 : vector<32x64xf32> to vector<32x64xbf16>
    %7 = vector.shape_cast %4 : vector<2x8x32xbf16> to vector<16x32xbf16>
    %cst = arith.constant dense<0.000000e+00> : vector<16x64xf32>
    %8 = tpu.matmul %7, %6, %cst {dimension_numbers = #tpu.dot_dimension_numbers<[1], [0], [0], [1], [0, 0, 1, 1], [], []>} : vector<16x32xbf16>, vector<32x64xbf16>, vector<16x64xf32> -> vector<16x64xf32>
    %9 = arith.truncf %8 : vector<16x64xf32> to vector<16x64xbf16>
    %10 = vector.shape_cast %9 : vector<16x64xbf16> to vector<2x8x64xbf16>
    "tpu.trace_start"() <{level = 10 : i32, message = "btk,blk->btl"}> : () -> ()
    %cst_7 = arith.constant dense<0.000000e+00> : vector<2x8x16xf32>
    %11 = tpu.matmul %10, %3, %cst_7 {dimension_numbers = #tpu.dot_dimension_numbers<[2], [2], [1], [1], [0, 0, 0, 1, 1, 1], [0], [0]>} : vector<2x8x64xbf16>, vector<2x16x64xbf16>, vector<2x8x16xf32> -> vector<2x8x16xf32>
    "tpu.trace_stop"() : () -> ()
    %12 = tpu.transpose %11, [1, 0, 2] : vector<2x8x16xf32> -> vector<8x2x16xf32>
    %c0_8 = arith.constant 0 : index
    %c0_9 = arith.constant 0 : index
    %13 = vector.load %arg5[%c0_8, %c0_9] : memref<2x16xf32, #tpu.memory_space<vmem>>, vector<2x16xf32>
    %14 = vector.shape_cast %13 : vector<2x16xf32> to vector<1x2x16xf32>
    %cst_10 = arith.constant 0.000000e+00 : f32
    %15 = vector.broadcast %cst_10 : f32 to vector<1x2x16xf32>
    %16 = arith.cmpf one, %14, %15 : vector<1x2x16xf32>
    %cst_11 = arith.constant 0xFF800000 : f32
    %17 = vector.shape_cast %16 : vector<1x2x16xi1> to vector<1x2x16xi1>
    %18 = vector.broadcast %17 : vector<1x2x16xi1> to vector<8x2x16xi1>
    %19 = vector.broadcast %cst_11 : f32 to vector<8x2x16xf32>
    %20 = arith.select %18, %19, %12 : vector<8x2x16xi1>, vector<8x2x16xf32>
    %c0_12 = arith.constant 0 : index
    %c0_13 = arith.constant 0 : index
    %c0_14 = arith.constant 0 : index
    %21 = vector.load %arg6[%c0_12, %c0_13, %c0_14] : memref<8x2x16xf32, #tpu.memory_space<vmem>>, vector<8x2x16xf32>
    tpu.vector_store %arg6[%c0_12, %c0_13, %c0_14], %20 {strides = array<i32>} : memref<8x2x16xf32, #tpu.memory_space<vmem>>, vector<8x2x16xf32>,
    return
  }
  func.func @transform_0(%arg0: i32, %arg1: i32) -> (i32, i32) {
    %c0_i32 = arith.constant 0 : i32
    %c0_i32_0 = arith.constant 0 : i32
    %c0_i32_1 = arith.constant 0 : i32
    return %c0_i32, %c0_i32_0 : i32, i32
  }
  func.func @transform_1(%arg0: i32, %arg1: i32) -> (i32, i32, i32) {
    %c0_i32 = arith.constant 0 : i32
    %c0_i32_0 = arith.constant 0 : i32
    %c0_i32_1 = arith.constant 0 : i32
    return %c0_i32, %arg0, %c0_i32_0 : i32, i32, i32
  }
  func.func @transform_2(%arg0: i32, %arg1: i32) -> (i32, i32, i32) {
    %c0_i32 = arith.constant 0 : i32
    %c0_i32_0 = arith.constant 0 : i32
    return %arg0, %arg1, %c0_i32 : i32, i32, i32
  }
  func.func @transform_3(%arg0: i32, %arg1: i32) -> (i32, i32) {
    %c0_i32 = arith.constant 0 : i32
    return %arg0, %arg1 : i32, i32
  }
  func.func @transform_4(%arg0: i32, %arg1: i32) -> (i32, i32, i32) {
    %c0_i32 = arith.constant 0 : i32
    %c0_i32_0 = arith.constant 0 : i32
    return %c0_i32, %arg0, %arg1 : i32, i32, i32
  }
}

</mosaic_0001>

<bundles_post_ra>
// kernel: tpu_custom_call.1
= control target key start
LH: loop header
LB: loop body
LE: loop exit
PB: predicated region body
PF: predicated region fallthrough
CT: control target
= control target key end

     0   :  { %9 = vsyncpa [#allocation3], 0  ;;  %s679_s0 = inlined_call_operand.hbm [shape: f32[32,64], index: 0, kind: input, shape index: {}]   ;;  %s680_s1 = inlined_call_operand.hbm [shape: f32[8,2,32], index: 1, kind: input, shape index: {}]   ;;  %s681_s2 = inlined_call_operand.hbm [shape: f32[2,16,64], index: 2, kind: input, shape index: {}]   ;;  %s682_s3 = inlined_call_operand.vmem [shape: f32[2,16], index: 3, kind: input, shape index: {}]   ;;  %s683_s4 = inlined_call_operand.hbm [shape: f32[8,2,16], index: 4, kind: output, shape index: {}]  }
   0x1   :  { %10 = vsyncpa [#allocation6], 0 }
   0x2   :  { %11 = vsyncpa [#allocation4], 0  ;;  %s539_s15 = smov [#allocation5]   ;;  %s445_s19 = scalar_lea.hbm %s680_s1, 256 }
   0x3   :  { %s29_s16 = sshll.u32 %s539_s15, 4  ;;  %p446_p0 = scmp.ne.s32.totalorder %s680_s1, %s445_s19  ;;  %s30_s16 = int_to_ptr.vmem [resolvable:$true] %s29_s16 }
   0x4   :  { %p449_p1 = scmp.lt.u32.totalorder %s445_s19, %s680_s1 }
   0x6   :  { %p451_p2 = pnand %p449_p1, %p446_p0 }
   0x8   :  { %454 = shalt.err (!%p451_p2)
}
   0x9   :  { %s455_s24 = scalar_lea.vmem %s30_s16, 256  ;;  %p460_p4 = scmp.lt.s32.totalorder %s30_s16, %s30_s16 }
   0xa   :  { %p456_p3 = scmp.ne.s32.totalorder %s30_s16, %s455_s24  ;;  %p461_p5 = scmp.lt.s32.totalorder %s455_s24, %s455_s24 }
   0xc   :  { %p462_p6 = por %p461_p5, %p460_p4 }
   0xe   :  { %p463_p7 = pnand %p462_p6, %p456_p3 }
  0x10   :  { %466 = shalt.err (!%p463_p7)
}
  0x11   :  { %s540_s25 = smov 32   ;;  %s541_s26 = smov 2  }
  0x12   :  { %35 = dma.hbm_to_vmem [thread:$0]  %s680_s1, 256, %s30_s16, [#allocation6], %s540_s25, %s540_s25, %s541_s26  }
  0x13   :  { %s542_s29 = smov [#allocation2]   ;;  %s467_s7 = scalar_lea.hbm %s679_s0, 512 }
  0x14   :  { %s17_s30 = sshll.u32 %s542_s29, 4  ;;  %p468_p8 = scmp.ne.s32.totalorder %s679_s0, %s467_s7  ;;  %s18_s30 = int_to_ptr.vmem [resolvable:$true] %s17_s30 }
  0x15   :  { %p471_p9 = scmp.lt.u32.totalorder %s467_s7, %s679_s0 }
  0x17   :  { %p473_p10 = pnand %p471_p9, %p468_p8 }
  0x19   :  { %476 = shalt.err (!%p473_p10)
}
  0x1a   :  { %s477_s12 = scalar_lea.vmem %s18_s30, 512  ;;  %p482_p12 = scmp.lt.s32.totalorder %s18_s30, %s18_s30 }
  0x1b   :  { %p478_p11 = scmp.ne.s32.totalorder %s18_s30, %s477_s12  ;;  %p483_p13 = scmp.lt.s32.totalorder %s477_s12, %s477_s12 }
  0x1d   :  { %p484_p0 = por %p483_p13, %p482_p12 }
  0x1f   :  { %p485_p1 = pnand %p484_p0, %p478_p11 }
  0x21   :  { %488 = shalt.err (!%p485_p1)
}
  0x22   :  { %s543_s1 = smov 128   ;;  %s544_s13 = smov 8  }
  0x23   :  { %23 = dma.hbm_to_vmem [thread:$0]  %s679_s0, 512, %s18_s30, [#allocation3], %s543_s1, %s543_s1, %s544_s13  }
  0x24   :  { %s545_s16 = smov [#allocation7]   ;;  %s489_s20 = scalar_lea.hbm %s681_s2, 512 }
  0x25   :  { %s41_s17 = sshll.u32 %s545_s16, 4  ;;  %p490_p2 = scmp.ne.s32.totalorder %s681_s2, %s489_s20  ;;  %s42_s17 = int_to_ptr.vmem [resolvable:$true] %s41_s17 }
  0x26   :  { %p493_p3 = scmp.lt.u32.totalorder %s489_s20, %s681_s2 }
  0x28   :  { %p495_p4 = pnand %p493_p3, %p490_p2 }
  0x2a   :  { %498 = shalt.err (!%p495_p4)
}
  0x2b   :  { %s499_s27 = scalar_lea.vmem %s42_s17, 512  ;;  %p504_p6 = scmp.lt.s32.totalorder %s42_s17, %s42_s17 }
  0x2c   :  { %p500_p5 = scmp.ne.s32.totalorder %s42_s17, %s499_s27  ;;  %p505_p7 = scmp.lt.s32.totalorder %s499_s27, %s499_s27 }
  0x2e   :  { %p506_p8 = por %p505_p7, %p504_p6 }
  0x30   :  { %p507_p9 = pnand %p506_p8, %p500_p5 }
  0x32   :  { %510 = shalt.err (!%p507_p9)
}
  0x33   :  { %47 = dma.hbm_to_vmem [thread:$0]  %s681_s2, 512, %s42_s17, [#allocation6], %s543_s1, %s543_s1, %s544_s13  }
  0x34   :  { %533 = dma.done.wait [#allocation3], 512  }
  0x35   :  { %534 = vsyncadd [#allocation3], 4294966784 }
  0x36   :  { %535 = dma.done.wait [#allocation6], 768  }
  0x37   :  { %536 = vsyncadd [#allocation6], 4294966528  ;;  %v86_v0 = vlaneseq  ;;  %v546_v1 = vmov 0.0   ;;  %vm547_vm0 = vmmov 0   ;;  %v548_v2 = vmov 1983009808  }
  0x38   :  { %413 = vmatprep.subr.bf16.mxu0 %v546_v1  ;;  %417 = vmatprep.mubr.msk.bf16.mxu0 %vm547_vm0, %v546_v1  ;;  %v84_v3 = vunpack.c.l.s4 %v548_v2  ;;  %v549_v6 = vmov 1934713408   ;;  %v136_v8 = vld [vmem:[#allocation2] sm:$0xff]  ;;  %v137_v9 = vld [vmem:[#allocation2 + $0x8] sm:$0xff]  ;;  %v138_v10 = vld [vmem:[#allocation2 + $0x10] sm:$0xff]  ;;  %vm196_vm1 = vcmask 523264  }
  0x39   :  { %421 = vmatprep.subr.bf16.mxu1 %v546_v1  ;;  %423 = vmatprep.mubr.msk.bf16.mxu1 %vm547_vm0, %v546_v1  ;;  %v87_v5 = vshrl.u32 %v86_v0, 7  ;;  %v100_v7 = vunpack.c.l.s4 %v549_v6  ;;  %v140_v11 = vpack.c.bf16 %v137_v9, %v136_v8  ;;  %v139_v12 = vld [vmem:[#allocation2 + $0x18] sm:$0xff]  ;;  %v60_v13 = vld [vmem:[#allocation5] sm:$0x3]  ;;  %v61_v14 = vld [vmem:[#allocation5 + $0x2] sm:$0x3] }
  0x3a   :  { %v85_v4 = vunpack.c.0.s8 %v84_v3  ;;  %v62_v16 = vld [vmem:[#allocation5 + $0x4] sm:$0x3]  ;;  %v63_v17 = vld [vmem:[#allocation5 + $0x6] sm:$0x3]  ;;  %v64_v18 = vld [vmem:[#allocation5 + $0x8] sm:$0x3]  ;;  %v141_v20 = vpack.c.bf16 %v139_v12, %v138_v10 }
  0x3b   :  { %v101_v19 = vunpack.c.0.s8 %v100_v7  ;;  %414 = vmatpush3.bf16.msra.mxu0 %v140_v11  ;;  %v65_v21 = vld [vmem:[#allocation5 + $0xa] sm:$0x3]  ;;  %v66_v22 = vld [vmem:[#allocation5 + $0xc] sm:$0x3]  ;;  %v67_v23 = vld [vmem:[#allocation5 + $0xe] sm:$0x3]  ;;  %v394_v24 = vpack.c.bf16 %v64_v18, %v60_v13 }
  0x3c   :  { %v621_v15 = vsub.s32 %v85_v4, %v87_v5  ;;  %415 = vmatprep.subr.bf16.mxu0 %v546_v1  ;;  %v395_v25 = vpack.c.bf16 %v66_v22, %v62_v16  ;;  %v396_v26 = vpack.c.bf16 %v65_v21, %v61_v14  ;;  %v397_v27 = vpack.c.bf16 %v67_v23, %v63_v17  ;;  %v76_v28 = vld [vmem:[#allocation7] sm:$0xff]  ;;  %v77_v29 = vld [vmem:[#allocation7 + $0x8] sm:$0xff]  ;;  %v78_v39 = vld [vmem:[#allocation7 + $0x10] sm:$0xff] }
  0x3d   :  { %v80_v31 = vpack.c.bf16 %v77_v29, %v76_v28  ;;  %v104_v33 = vsub.s32 %v101_v19, %v87_v5  ;;  %v79_v40 = vld [vmem:[#allocation7 + $0x18] sm:$0xff]  ;;  %vm145_vm2 = vcmask 261120   ;;  %v355_v0 = vld [vmem:[%s682_s3] sm:$0x3]  ;;  %vm367_vm4 = vcmask 123904   ;;  %s550_s3 = smov [#allocation8]  }
  0x3e   :  { %v89_v30 = vrot.slane %v394_v24, %v621_v15  ;;  %v97_v32 = vrot.slane %v395_v25, %v621_v15  ;;  %v113_v34 = vrot.slane %v396_v26, %v621_v15  ;;  %v121_v35 = vrot.slane %v397_v27, %v621_v15  ;;  %s381_s30 = sshll.u32 %s550_s3, 4  ;;  %s382_s30 = int_to_ptr.vmem [resolvable:$true] %s381_s30 }
  0x3f   :  { %416 = vmatpush3.bf16.msra.mxu0 %v141_v20  ;;  %v201_v36 = vsel %vm196_vm1, %v80_v31, 0  ;;  %v81_v46 = vpack.c.bf16 %v79_v40, %v78_v39  ;;  %vm356_vm3 = vcmp.ne.f32.partialorder %v355_v0, 0.0  ;;  %s511_s5 = scalar_lea.vmem %s382_s30, 256  ;;  %p516_p11 = scmp.lt.s32.totalorder %s382_s30, %s382_s30 }
  0x40   :  { %v98_v37 = vcombine.low %v89_v30, %v97_v32  ;;  %v122_v38 = vcombine.low %v113_v34, %v121_v35  ;;  %422 = vmatpush3.bf16.xpose.msra.mxu1 %v201_v36  ;;  %427 = vmatprep.subr.bf16.mxu0 %v546_v1  ;;  %p512_p10 = scmp.ne.s32.totalorder %s382_s30, %s511_s5  ;;  %p517_p12 = scmp.lt.s32.totalorder %s511_s5, %s511_s5 }
  0x41   :  { %v247_v49 = vsel %vm196_vm1, %v81_v46, 0 }
  0x42   :  { %v105_v41 = vrot.slane %v98_v37, %v104_v33  ;;  %v129_v42 = vrot.slane %v122_v38, %v104_v33  ;;  %p518_p13 = por %p517_p12, %p516_p11 }
  0x44   :  { %v132_v43 = vpack.i.b16 %v129_v42, %v105_v41  ;;  %v133_v44 = vshrl.u32 %v105_v41, 16  ;;  %v134_v45 = vshrl.u32 %v129_v42, 16  ;;  %p519_p0 = pnand %p518_p13, %p512_p10 }
  0x46   :  { %v135_v47 = vpack.i.b16 %v134_v45, %v133_v44 }
  0x48   :  { %v398_v48 = vcombine.low %v132_v43, %v135_v47 }
  0x4a   :  { %418 = vmatmul.mubr.msk.bf16.vlgmr.msra.gmra.mrb[0].mxu0 %vm145_vm2, %v398_v48 }
  0x4b   :  { %428 = vmatpush3.bf16.xpose.msra.mxu0 %v247_v49  ;;  %429 = vmatprep.mubr.msk.bf16.mxu0 %vm547_vm0, %v546_v1 }
 0x11d   :  { %v183_v50 = vpop.f32.mrb[0].mxu0 }
 0x11e   :  { %v404_v51 = vpack.c.bf16 %v183_v50, %v183_v50  ;;  %v419_v52 = vpop.f32.mrb[1].mxu0 }
 0x11f   :  { %v186_v53 = vpop.f32.mrb[2].mxu0 }
 0x120   :  { %v405_v54 = vpack.c.bf16 %v186_v53, %v186_v53  ;;  %v420_v55 = vpop.f32.mrb[3].mxu0  ;;  %424 = vmatmul.mubr.msk.bf16.vlgmr.msra.gmra.mrb[0].mxu1 %vm196_vm1, %v404_v51 }
 0x122   :  { %430 = vmatmul.mubr.msk.bf16.vlgmr.msra.gmra.mrb[4].mxu0 %vm196_vm1, %v405_v54 }
 0x1f3   :  { %v237_v56 = vpop.f32.mrb[0].mxu1 }
 0x1f4   :  { %v289_v57 = vcombine.high %v237_v56, %v546_v1  ;;  %v425_v58 = vpop.f32.mrb[1].mxu1  ;;  %v296_v61 = vrot.slane %v237_v56, %v621_v15 }
 0x1f5   :  { %v240_v59 = vpop.f32.mrb[2].mxu1  ;;  %v283_v60 = vpop.f32.mrb[4].mxu0 }
 0x1f6   :  { %v304_v62 = vcombine.high %v283_v60, %v546_v1  ;;  %v311_v63 = vrot.slane %v283_v60, %v621_v15  ;;  %v426_v2 = vpop.f32.mrb[3].mxu1  ;;  %v431_v3 = vpop.f32.mrb[5].mxu0  ;;  %v303_v5 = vrot.slane %v289_v57, %v621_v15 }
 0x1f7   :  { %v286_v4 = vpop.f32.mrb[6].mxu0 }
 0x1f8   :  { %v318_v6 = vrot.slane %v304_v62, %v621_v15  ;;  %v319_v7 = vcombine.low %v296_v61, %v311_v63  ;;  %v320_v8 = vcombine.high %v296_v61, %v311_v63  ;;  %v432_v9 = vpop.f32.mrb[7].mxu0 }
 0x1fa   :  { %v327_v10 = vrot.slane %v319_v7, %v104_v33  ;;  %v334_v11 = vrot.slane %v320_v8, %v104_v33  ;;  %v335_v12 = vcombine.low %v303_v5, %v318_v6  ;;  %v336_v13 = vcombine.high %v303_v5, %v318_v6 }
 0x1fc   :  { %v343_v14 = vrot.slane %v335_v12, %v104_v33  ;;  %v350_v16 = vrot.slane %v336_v13, %v104_v33  ;;  %v351_v17 = vcombine.high %v327_v10, %v546_v1  ;;  %v352_v18 = vcombine.high %v334_v11, %v546_v1 }
 0x1fd   :  { %v359_v19 = vsel %vm356_vm3, -inf, %v327_v10  ;;  %v361_v15 = vsel %vm356_vm3, -inf, %v334_v11 }
 0x1fe   :  { %v353_v20 = vcombine.high %v343_v14, %v546_v1  ;;  %v354_v21 = vcombine.high %v350_v16, %v546_v1  ;;  %v360_v22 = vsel %vm356_vm3, -inf, %v351_v17  ;;  %v362_v23 = vsel %vm356_vm3, -inf, %v352_v18  ;;  %368 = vst.msk [vmem:[#allocation8] sm:$0x3] %vm367_vm4, %v359_v19  ;;  %370 = vst.msk [vmem:[#allocation8 + $0x4] sm:$0x3] %vm367_vm4, %v361_v15 }
 0x1ff   :  { %v363_v24 = vsel %vm356_vm3, -inf, %v343_v14  ;;  %v365_v25 = vsel %vm356_vm3, -inf, %v350_v16  ;;  %369 = vst.msk [vmem:[#allocation8 + $0x2] sm:$0x3] %vm367_vm4, %v360_v22  ;;  %371 = vst.msk [vmem:[#allocation8 + $0x6] sm:$0x3] %vm367_vm4, %v362_v23 }
 0x200   :  { %v364_v26 = vsel %vm356_vm3, -inf, %v353_v20  ;;  %v366_v1 = vsel %vm356_vm3, -inf, %v354_v21  ;;  %372 = vst.msk [vmem:[#allocation8 + $0x8] sm:$0x3] %vm367_vm4, %v363_v24  ;;  %374 = vst.msk [vmem:[#allocation8 + $0xc] sm:$0x3] %vm367_vm4, %v365_v25 }
 0x201   :  { %373 = vst.msk [vmem:[#allocation8 + $0xa] sm:$0x3] %vm367_vm4, %v364_v26  ;;  %375 = vst.msk [vmem:[#allocation8 + $0xe] sm:$0x3] %vm367_vm4, %v366_v1 }
 0x202   :  { %522 = shalt.err (!%p519_p0)
}
 0x203   :  { %s523_s8 = scalar_lea.hbm %s683_s4, 256 }
 0x204   :  { %p524_p1 = scmp.ne.s32.totalorder %s683_s4, %s523_s8  ;;  %p527_p2 = scmp.lt.u32.totalorder %s523_s8, %s683_s4 }
 0x206   :  { %p529_p3 = pnand %p527_p2, %p524_p1 }
 0x208   :  { %532 = shalt.err (!%p529_p3)
}
 0x209   :  { %387 = dma.vmem_to_hbm [thread:$0]  %s382_s30, 256, %s683_s4, [#allocation4], %s540_s25, %s540_s25, %s541_s26  }
 0x20a   :  { %537 = dma.done.wait [#allocation4], 256  }
 0x20b   :  { %538 = vsyncadd [#allocation4], 4294967040 }
 0x20c   :  { %391 = vsyncpa [#allocation3], 1 }
 0x20d   :  { %392 = vsyncpa [#allocation6], 1 }
 0x20e   :  { %393 = vsyncpa [#allocation4], 1 }

</bundles_post_ra>
